<compile_context>
chip_gen: v7x
topology: tpu7x:2x2x1
jax: 0.10.0
libtpu: 0.0.40
codegen_flags: <defaults>
</compile_context>

<pallas_src>
import functools

import jax
import jax.numpy as jnp
from jax.experimental import pallas as pl
from jax.experimental.pallas import tpu as pltpu

_LANES = 128
_MAX_TK = 2048                           # max spatial lanes per chunk (multiple of 128)
_MAX_TR = 8192                           # cap on rows per block (bounds f32 temporaries)
_TARGET_BLOCK_BYTES = 8 * 1024 * 1024    # ~8 MiB input DMA per grid step
_VMEM_LIMIT_BYTES = 48 * 1024 * 1024     # safe on v5e/v6e (128 MiB) and v7x (64 MiB phys)


def _round_up(x, m):
    return ((x + m - 1) // m) * m


def _sublane_multiple(dtype):
    # Min sublane tile: 8 for 4-byte, 16 for 2-byte, 32 for 1-byte dtypes.
    return max(8, 32 // jnp.dtype(dtype).itemsize)


def _single_chunk_kernel(x_ref, o_ref, *, hw, inv_hw):
    """HW fits in one chunk: fold lanes (VPU), one cross-lane reduce, scale, store."""
    groups = hw // _LANES
    rem = hw - groups * _LANES
    if groups == 0:
        # HW < 128: reduce the narrow block directly.
        s = jnp.sum(x_ref[...].astype(jnp.float32), axis=-1, keepdims=True)
    else:
        # Aligned 128-lane group folds (pure VPU adds, loads pushed into the loop).
        acc = x_ref[:, 0:_LANES].astype(jnp.float32)
        for g in range(1, groups):
            acc = acc + x_ref[:, g * _LANES:(g + 1) * _LANES].astype(jnp.float32)
        s = jnp.sum(acc, axis=-1, keepdims=True)
        if rem:
            tail = x_ref[:, groups * _LANES:hw].astype(jnp.float32)
            s = s + jnp.sum(tail, axis=-1, keepdims=True)
    o_ref[...] = (s * inv_hw).astype(o_ref.dtype)


def _multi_chunk_kernel(x_ref, o_ref, *, hw, tk, tr, ragged):
    """HW > _MAX_TK: accumulate lane-folded partial sums into the (TR,128) output."""
    k = pl.program_id(1)

    @pl.when(k == 0)
    def _():
        o_ref[...] = jnp.zeros_like(o_ref)

    groups = tk // _LANES
    base = k * tk
    acc = None
    for g in range(groups):
        v = x_ref[:, g * _LANES:(g + 1) * _LANES].astype(jnp.float32)
        if ragged:
            # Mask lanes past the true spatial extent (last chunk over-reads garbage).
            col = base + g * _LANES + jax.lax.broadcasted_iota(jnp.int32, (tr, _LANES), 1)
            v = jnp.where(col < hw, v, jnp.float32(0.0))
        acc = v if acc is None else acc + v
    o_ref[...] = o_ref[...] + acc


def global_pool2d(x):
    """x: (N, C, H, W) -> (N, C) via mean over dims (2, 3). Matches GlobalPool2d."""
    N, C, H, W = x.shape
    HW = H * W
    R = N * C
    dtype = x.dtype
    itemsize = jnp.dtype(dtype).itemsize
    sub = _sublane_multiple(dtype)
    inv_hw = 1.0 / float(HW)

    x_flat = x.reshape(R, HW)   # no padding copy — just a view-style reshape

    # ---- Spatial (HW) chunking: no padding is ever materialized. -----------
    if HW <= _MAX_TK:
        nk, TK = 1, HW                       # full-dim block: 128-divisibility waived
    else:
        nk = pl.cdiv(HW, _MAX_TK)
        TK = _round_up(pl.cdiv(HW, nk), _LANES)   # <= _MAX_TK since _MAX_TK % 128 == 0
        nk = pl.cdiv(HW, TK)
    ragged = (nk * TK) != HW                 # last chunk over-reads -> mask in kernel

    # ---- Row blocking: balanced, dtype-aware sublane multiple. -------------
    rows_budget = max(sub, _TARGET_BLOCK_BYTES // (TK * itemsize))
    rows_budget = min(rows_budget, _MAX_TR)
    nr = pl.cdiv(R, rows_budget)
    TR = _round_up(pl.cdiv(R, nr), sub)
    # v7x megacore: keep the parallel row axis at >= 2 blocks whenever possible.
    if pl.cdiv(R, TR) < 2 and R > sub:
        TR = _round_up(pl.cdiv(R, 2), sub)
    TR = max(sub, min(TR, _round_up(R, sub)))
    nr = pl.cdiv(R, TR)

    if nk == 1:
        kernel = functools.partial(_single_chunk_kernel, hw=HW, inv_hw=inv_hw)
        out = pl.pallas_call(
            kernel,
            out_shape=jax.ShapeDtypeStruct((R, 1), dtype),
            grid_spec=pltpu.PrefetchScalarGridSpec(
                num_scalar_prefetch=0,
                grid=(nr,),
                in_specs=[pl.BlockSpec((TR, TK), lambda r: (r, 0))],
                out_specs=pl.BlockSpec((TR, 1), lambda r: (r, 0)),
            ),
            compiler_params=pltpu.CompilerParams(
                dimension_semantics=("parallel",),
                vmem_limit_bytes=_VMEM_LIMIT_BYTES,
            ),
        )(x_flat)
        return out[:, 0].reshape(N, C)

    # HW > _MAX_TK: lane-dense (R, 128) f32 partial sums, tiny finish in XLA.
    kernel = functools.partial(_multi_chunk_kernel, hw=HW, tk=TK, tr=TR, ragged=ragged)
    partial = pl.pallas_call(
        kernel,
        out_shape=jax.ShapeDtypeStruct((R, _LANES), jnp.float32),
        grid_spec=pltpu.PrefetchScalarGridSpec(
            num_scalar_prefetch=0,
            grid=(nr, nk),                    # rows parallel, spatial reduction last
            in_specs=[pl.BlockSpec((TR, TK), lambda r, k: (r, k))],
            out_specs=pl.BlockSpec((TR, _LANES), lambda r, k: (r, 0)),
        ),
        compiler_params=pltpu.CompilerParams(
            dimension_semantics=("parallel", "arbitrary"),
            vmem_limit_bytes=_VMEM_LIMIT_BYTES,
        ),
    )(x_flat)
    return (jnp.sum(partial, axis=-1) * inv_hw).astype(dtype).reshape(N, C)


if __name__ == "__main__":
    key = jax.random.PRNGKey(0)

    def _check(shape):
        x = jax.random.normal(jax.random.fold_in(key, shape[2] * shape[3]),
                              shape, dtype=jnp.float32)
        out = global_pool2d(x)
        jax.block_until_ready(out)
        ref = jnp.mean(x, axis=(2, 3)).reshape(-1, shape[1])
        assert out.shape == ref.shape, (out.shape, ref.shape)
        assert jnp.allclose(out, ref, atol=1e-5, rtol=1e-5), f"mismatch for {shape}"

    # Primary small example consistent with the module.
    _check((2, 4, 16, 16))    # HW=256: single chunk, aligned lane-group folds
    _check((2, 4, 7, 7))      # HW=49:  single chunk, narrow (<128 lane) reduce
    _check((2, 4, 14, 14))    # HW=196: single chunk with ragged tail group
    _check((2, 4, 64, 64))    # HW=4096: multi-chunk accumulate (divisible)
    _check((2, 2, 50, 50))    # HW=2500: multi-chunk with ragged-lane masking

    print("KERNEL_OK")
</pallas_src>

<mosaic_0001>
module attributes {stable_mosaic.version = 11 : i64} {
  func.func @_single_chunk_kernel(%arg0: i32, %arg1: memref<8x256xf32, #tpu.memory_space<vmem>>, %arg2: memref<8x1xf32, #tpu.memory_space<vmem>>) attributes {dimension_semantics = [#tpu.dimension_semantics<parallel>], iteration_bounds = array<i64: 1>, scalar_prefetch = 0 : i64, scratch_operands = 0 : i64, tpu.core_type = #tpu.core_type<tc>, window_params = [{transform_indices = @transform_0, window_bounds = array<i64: 8, 256>}, {transform_indices = @transform_1, window_bounds = array<i64: 8, 1>}]} {
    %c0 = arith.constant 0 : index
    %c0_0 = arith.constant 0 : index
    %0 = vector.load %arg1[%c0, %c0_0] : memref<8x256xf32, #tpu.memory_space<vmem>>, vector<8x128xf32>
    %c0_1 = arith.constant 0 : index
    %c128 = arith.constant 128 : index
    %1 = vector.load %arg1[%c0_1, %c128] : memref<8x256xf32, #tpu.memory_space<vmem>>, vector<8x128xf32>
    %2 = arith.addf %0, %1 : vector<8x128xf32>
    %cst = arith.constant dense<0.000000e+00> : vector<8xf32>
    %3 = vector.multi_reduction <add>, %2, %cst [1] : vector<8x128xf32> to vector<8xf32>
    %4 = vector.shape_cast %3 : vector<8xf32> to vector<8x1xf32>
    %cst_2 = arith.constant 3.906250e-03 : f32
    %5 = vector.broadcast %cst_2 : f32 to vector<8x1xf32>
    %6 = arith.mulf %4, %5 : vector<8x1xf32>
    %c0_3 = arith.constant 0 : index
    %c0_4 = arith.constant 0 : index
    %7 = vector.load %arg2[%c0_3, %c0_4] : memref<8x1xf32, #tpu.memory_space<vmem>>, vector<8x1xf32>
    tpu.vector_store %arg2[%c0_3, %c0_4], %6 {strides = array<i32>} : memref<8x1xf32, #tpu.memory_space<vmem>>, vector<8x1xf32>,
    return
  }
  func.func @transform_0(%arg0: i32) -> (i32, i32) {
    %c0_i32 = arith.constant 0 : i32
    %c0_i32_0 = arith.constant 0 : i32
    return %arg0, %c0_i32 : i32, i32
  }
  func.func @transform_1(%arg0: i32) -> (i32, i32) {
    %c0_i32 = arith.constant 0 : i32
    %c0_i32_0 = arith.constant 0 : i32
    return %arg0, %c0_i32 : i32, i32
  }
}

</mosaic_0001>

<bundles_post_ra>
// kernel: tpu_custom_call.1
= control target key start
LH: loop header
LB: loop body
LE: loop exit
PB: predicated region body
PF: predicated region fallthrough
CT: control target
= control target key end

     0   :  { %6 = vsyncpa [#allocation3], 0  ;;  %s58_s6 = smov [#allocation2]   ;;  %s84_s0 = inlined_call_operand.hbm [shape: f32[8,256], index: 0, kind: input, shape index: {}]   ;;  %s85_s1 = inlined_call_operand.vmem [shape: f32[8,1], index: 1, kind: output, shape index: {}]  }
   0x1   :  { %s13_s7 = sshll.u32 %s58_s6, 4  ;;  %s34_s10 = scalar_lea.hbm %s84_s0, 256  ;;  %s14_s7 = int_to_ptr.vmem [resolvable:$true] %s13_s7 }
   0x2   :  { %p35_p0 = scmp.ne.s32.totalorder %s84_s0, %s34_s10  ;;  %p38_p1 = scmp.lt.u32.totalorder %s34_s10, %s84_s0 }
   0x4   :  { %p40_p2 = pnand %p38_p1, %p35_p0 }
   0x6   :  { %43 = shalt.err (!%p40_p2)
}
   0x7   :  { %s44_s15 = scalar_lea.vmem %s14_s7, 256  ;;  %p49_p4 = scmp.lt.s32.totalorder %s14_s7, %s14_s7 }
   0x8   :  { %p45_p3 = scmp.ne.s32.totalorder %s14_s7, %s44_s15  ;;  %p50_p5 = scmp.lt.s32.totalorder %s44_s15, %s44_s15 }
   0xa   :  { %p51_p6 = por %p50_p5, %p49_p4 }
   0xc   :  { %p52_p7 = pnand %p51_p6, %p45_p3 }
   0xe   :  { %55 = shalt.err (!%p52_p7)
}
   0xf   :  { %16 = dma.hbm_to_vmem [thread:$0]  %s84_s0, 256, %s14_s7, [#allocation3]  }
  0x10   :  { %56 = dma.done.wait [#allocation3], 256  }
  0x11   :  { %57 = vsyncadd [#allocation3], 4294967040  ;;  %v20_v0 = vld [vmem:[#allocation2] sm:$0xff]  ;;  %v21_v1 = vld [vmem:[#allocation2 + $0x8] sm:$0xff]  ;;  %vm26_vm0 = vcmask 7168  }
  0x12   :  { %v22_v2 = vadd.f32 %v21_v1, %v20_v0 }
  0x14   :  { %23 = vadd.xlane.f32.xlu0 %v22_v2 }
  0xa1   :  { %v24_v3 = vpop.xlane.xlu0 %23 }
  0xa2   :  { %v25_v4 = vmul.f32 0.00390625, %v24_v3 }
  0xa4   :  { %27 = vst.msk [vmem:[%s85_s1] sm:$0xff] %vm26_vm0, %v25_v4 }
  0xa5   :  { %32 = vsyncpa [#allocation3], 1 }

</bundles_post_ra>
